<compile_context>
chip_gen: v6e
topology: v6e:2x2x1
jax: 0.10.0
libtpu: 0.0.40
codegen_flags: <defaults>
</compile_context>

<pallas_src>
import jax
import jax.numpy as jnp
from jax.experimental import pallas as pl
from jax.experimental.pallas import tpu as pltpu

_LANE = 1024          # lane-dense last dim (multiple of 128, wide -> unmasked vst)
_TILE_ROWS = 1024     # 1024 x 1024 f32 = 4 MiB per tile buffer


def _gol_kernel(nbr_ref, cur_ref, out_ref):
    # All refs view the same (tile_rows, _LANE) 2-D block.
    nbr = nbr_ref[...]
    cur = cur_ref[...]
    n3 = nbr == 3.0
    survive = (cur == 1.0) & (n3 | (nbr == 2.0))
    born = (cur == 0.0) & n3
    out_ref[...] = jnp.where(survive | born, 1.0, 0.0).astype(out_ref.dtype)


def game_of_life(neighbors: jax.Array, current_state: jax.Array) -> jax.Array:
    """Game-of-Life update. Inputs (B, H, W) -> output (B, 1, H, W) float32."""
    assert neighbors.shape == current_state.shape
    B, H, W = neighbors.shape
    n = B * H * W

    # ---- lane-dense 2-D layout: pad n to a multiple of 8 * _LANE ----
    pad = (-n) % (8 * _LANE)
    nbr_flat = neighbors.astype(jnp.float32).reshape(-1)
    cur_flat = current_state.astype(jnp.float32).reshape(-1)
    if pad:
        # Zero padding is safe: cur==0 & nbr==0 -> output 0, sliced off below.
        nbr_flat = jnp.pad(nbr_flat, (0, pad))
        cur_flat = jnp.pad(cur_flat, (0, pad))
    rows = (n + pad) // _LANE            # always a multiple of 8
    nbr2 = nbr_flat.reshape(rows, _LANE)
    cur2 = cur_flat.reshape(rows, _LANE)

    # ---- tile the row axis (full-array block when small) ----
    tile_rows = min(rows, _TILE_ROWS)    # rows is 8-aligned, so tile_rows is too
    grid = (pl.cdiv(rows, tile_rows),)

    out2 = pl.pallas_call(
        _gol_kernel,
        out_shape=jax.ShapeDtypeStruct((rows, _LANE), jnp.float32),
        grid=grid,
        in_specs=[
            pl.BlockSpec((tile_rows, _LANE), lambda i: (i, 0)),
            pl.BlockSpec((tile_rows, _LANE), lambda i: (i, 0)),
        ],
        out_specs=pl.BlockSpec((tile_rows, _LANE), lambda i: (i, 0)),
        compiler_params=pltpu.CompilerParams(
            dimension_semantics=("parallel",),
            vmem_limit_bytes=48 * 1024 * 1024,
        ),
    )(nbr2, cur2)

    out_flat = out2.reshape(-1)
    if pad:
        out_flat = out_flat[:n]
    # Channel "unsqueeze" is pure metadata — done here, not in the kernel.
    return out_flat.reshape(B, 1, H, W)


def _reference(neighbors, current_state):
    """Pure-JAX mirror of the PyTorch forward (nested where + unsqueeze)."""
    return jnp.where(
        (current_state == 1.0) & ((neighbors == 2.0) | (neighbors == 3.0)),
        1.0,
        jnp.where((current_state == 0.0) & (neighbors == 3.0), 1.0, 0.0),
    )[:, None, :, :].astype(jnp.float32)


if __name__ == "__main__":
    key = jax.random.PRNGKey(0)

    # Case 1: the canonical small shape.
    k_state, k_nbr = jax.random.split(key)
    B, H, W = 2, 16, 16
    current_state = jax.random.bernoulli(k_state, 0.5, (B, H, W)).astype(jnp.float32)
    neighbors = jax.random.randint(k_nbr, (B, H, W), 0, 9).astype(jnp.float32)

    out = jax.block_until_ready(game_of_life(neighbors, current_state))
    ref = _reference(neighbors, current_state)
    assert out.shape == (B, 1, H, W), out.shape
    assert out.dtype == jnp.float32, out.dtype
    assert jnp.array_equal(out, ref), "mismatch vs reference (small case)"

    # Case 2: awkward shape exercising the padding path.
    k_state2, k_nbr2 = jax.random.split(jax.random.fold_in(key, 1))
    B2, H2, W2 = 3, 17, 23
    cur2 = jax.random.bernoulli(k_state2, 0.5, (B2, H2, W2)).astype(jnp.float32)
    nbr2 = jax.random.randint(k_nbr2, (B2, H2, W2), 0, 9).astype(jnp.float32)

    out2 = jax.block_until_ready(game_of_life(nbr2, cur2))
    ref2 = _reference(nbr2, cur2)
    assert out2.shape == (B2, 1, H2, W2), out2.shape
    assert jnp.array_equal(out2, ref2), "mismatch vs reference (padded case)"

    # Case 3: larger shape exercising the multi-tile (grid > 1) path.
    k_state3, k_nbr3 = jax.random.split(jax.random.fold_in(key, 2))
    B3, H3, W3 = 4, 512, 1024  # 2M elems -> 2 grid steps at 1M-elem tiles
    cur3 = jax.random.bernoulli(k_state3, 0.5, (B3, H3, W3)).astype(jnp.float32)
    nbr3 = jax.random.randint(k_nbr3, (B3, H3, W3), 0, 9).astype(jnp.float32)

    out3 = jax.block_until_ready(game_of_life(nbr3, cur3))
    ref3 = _reference(nbr3, cur3)
    assert out3.shape == (B3, 1, H3, W3), out3.shape
    assert jnp.array_equal(out3, ref3), "mismatch vs reference (multi-tile case)"

    print("KERNEL_OK")
</pallas_src>

<mosaic_0001>
module attributes {stable_mosaic.version = 11 : i64} {
  func.func @_gol_kernel(%arg0: i32, %arg1: memref<8x1024xf32, #tpu.memory_space<vmem>>, %arg2: memref<8x1024xf32, #tpu.memory_space<vmem>>, %arg3: memref<8x1024xf32, #tpu.memory_space<vmem>>) attributes {dimension_semantics = [#tpu.dimension_semantics<parallel>], iteration_bounds = array<i64: 1>, scalar_prefetch = 0 : i64, scratch_operands = 0 : i64, tpu.core_type = #tpu.core_type<tc>, window_params = [{transform_indices = @transform_0, window_bounds = array<i64: 8, 1024>}, {transform_indices = @transform_1, window_bounds = array<i64: 8, 1024>}, {transform_indices = @transform_2, window_bounds = array<i64: 8, 1024>}]} {
    %c0 = arith.constant 0 : index
    %c0_0 = arith.constant 0 : index
    %0 = vector.load %arg1[%c0, %c0_0] : memref<8x1024xf32, #tpu.memory_space<vmem>>, vector<8x1024xf32>
    %c0_1 = arith.constant 0 : index
    %c0_2 = arith.constant 0 : index
    %1 = vector.load %arg2[%c0_1, %c0_2] : memref<8x1024xf32, #tpu.memory_space<vmem>>, vector<8x1024xf32>
    %cst = arith.constant 3.000000e+00 : f32
    %2 = vector.broadcast %cst : f32 to vector<8x1024xf32>
    %3 = arith.cmpf oeq, %0, %2 : vector<8x1024xf32>
    %cst_3 = arith.constant 1.000000e+00 : f32
    %4 = vector.broadcast %cst_3 : f32 to vector<8x1024xf32>
    %5 = arith.cmpf oeq, %1, %4 : vector<8x1024xf32>
    %cst_4 = arith.constant 2.000000e+00 : f32
    %6 = vector.broadcast %cst_4 : f32 to vector<8x1024xf32>
    %7 = arith.cmpf oeq, %0, %6 : vector<8x1024xf32>
    %8 = arith.ori %3, %7 : vector<8x1024xi1>
    %9 = arith.andi %5, %8 : vector<8x1024xi1>
    %cst_5 = arith.constant 0.000000e+00 : f32
    %10 = vector.broadcast %cst_5 : f32 to vector<8x1024xf32>
    %11 = arith.cmpf oeq, %1, %10 : vector<8x1024xf32>
    %12 = arith.andi %11, %3 : vector<8x1024xi1>
    %13 = arith.ori %9, %12 : vector<8x1024xi1>
    %cst_6 = arith.constant 1.000000e+00 : f32
    %cst_7 = arith.constant 0.000000e+00 : f32
    %14 = vector.broadcast %cst_6 : f32 to vector<8x1024xf32>
    %15 = vector.broadcast %cst_7 : f32 to vector<8x1024xf32>
    %16 = arith.select %13, %14, %15 : vector<8x1024xi1>, vector<8x1024xf32>
    %c0_8 = arith.constant 0 : index
    %c0_9 = arith.constant 0 : index
    %17 = vector.load %arg3[%c0_8, %c0_9] : memref<8x1024xf32, #tpu.memory_space<vmem>>, vector<8x1024xf32>
    tpu.vector_store %arg3[%c0_8, %c0_9], %16 {strides = array<i32>} : memref<8x1024xf32, #tpu.memory_space<vmem>>, vector<8x1024xf32>,
    return
  }
  func.func @transform_0(%arg0: i32) -> (i32, i32) {
    %c0_i32 = arith.constant 0 : i32
    %c0_i32_0 = arith.constant 0 : i32
    return %arg0, %c0_i32 : i32, i32
  }
  func.func @transform_1(%arg0: i32) -> (i32, i32) {
    %c0_i32 = arith.constant 0 : i32
    %c0_i32_0 = arith.constant 0 : i32
    return %arg0, %c0_i32 : i32, i32
  }
  func.func @transform_2(%arg0: i32) -> (i32, i32) {
    %c0_i32 = arith.constant 0 : i32
    %c0_i32_0 = arith.constant 0 : i32
    return %arg0, %c0_i32 : i32, i32
  }
}

</mosaic_0001>

<bundles_post_ra>
// kernel: tpu_custom_call.1
= control target key start
LH: loop header
LB: loop body
LE: loop exit
PB: predicated region body
PF: predicated region fallthrough
CT: control target
= control target key end

     0   :  { %7 = vsyncpa [#allocation3], 0  ;;  %s256_s0 = inlined_call_operand.hbm [shape: f32[8,1024], index: 0, kind: input, shape index: {}]   ;;  %s257_s1 = inlined_call_operand.hbm [shape: f32[8,1024], index: 1, kind: input, shape index: {}]   ;;  %s258_s2 = inlined_call_operand.hbm [shape: f32[8,1024], index: 2, kind: output, shape index: {}]  }
   0x1   :  { %8 = vsyncpa [#allocation6], 0 }
   0x2   :  { %9 = vsyncpa [#allocation4], 0  ;;  %s218_s9 = smov [#allocation2]   ;;  %s219_s11 = smov [#allocation5]  }
   0x3   :  { %s16_s10 = sshll.u32 %s218_s9, 4  ;;  %s26_s12 = sshll.u32 %s219_s11, 4  ;;  %s17_s10 = int_to_ptr.vmem [resolvable:$true] %s16_s10  ;;  %s27_s12 = int_to_ptr.vmem [resolvable:$true] %s26_s12 }
   0x4   :  { %s160_s13 = scalar_lea.vmem %s17_s10, 1024  ;;  %p165_p1 = scmp.lt.s32.totalorder %s17_s10, %s17_s10 }
   0x5   :  { %p161_p0 = scmp.ne.s32.totalorder %s17_s10, %s160_s13  ;;  %p166_p2 = scmp.lt.s32.totalorder %s160_s13, %s160_s13 }
   0x7   :  { %p167_p3 = por %p166_p2, %p165_p1 }
   0x9   :  { %p168_p4 = pnand %p167_p3, %p161_p0 }
   0xb   :  { %171 = shalt.err (!%p168_p4)
}
   0xc   :  { %19 = dma.hbm_to_vmem [thread:$0]  %s256_s0, 1024, %s17_s10, [#allocation3]  }
   0xd   :  { %s180_s16 = scalar_lea.vmem %s27_s12, 1024  ;;  %p185_p6 = scmp.lt.s32.totalorder %s27_s12, %s27_s12 }
   0xe   :  { %p181_p5 = scmp.ne.s32.totalorder %s27_s12, %s180_s16  ;;  %p186_p7 = scmp.lt.s32.totalorder %s180_s16, %s180_s16 }
  0x10   :  { %p187_p8 = por %p186_p7, %p185_p6 }
  0x12   :  { %p188_p9 = pnand %p187_p8, %p181_p5 }
  0x14   :  { %191 = shalt.err (!%p188_p9)
}
  0x15   :  { %29 = dma.hbm_to_vmem [thread:$0]  %s257_s1, 1024, %s27_s12, [#allocation6]  }
  0x16   :  { %212 = dma.done.wait [#allocation3], 1024  }
  0x17   :  { %213 = vsyncadd [#allocation3], 4294966272 }
  0x18   :  { %214 = dma.done.wait [#allocation6], 1024  }
  0x19   :  { %215 = vsyncadd [#allocation6], 4294966272  ;;  %v36_v0 = vld [vmem:[#allocation2] sm:$0xff]  ;;  %v37_v2 = vld [vmem:[#allocation2 + $0x8] sm:$0xff]  ;;  %v220_v6 = vmov 0.0   ;;  %s221_s0 = smov [#allocation7]  }
  0x1a   :  { %v44_v1 = vld [vmem:[#allocation5] sm:$0xff]  ;;  %vm52_vm0 = vcmp.eq.f32.partialorder %v36_v0, 3.0  ;;  %vm68_vm2 = vcmp.eq.f32.partialorder %v36_v0, 2.0  ;;  %v45_v3 = vld [vmem:[#allocation5 + $0x8] sm:$0xff]  ;;  %vm53_vm6 = vcmp.eq.f32.partialorder %v37_v2, 3.0  ;;  %vm69_vm7 = vcmp.eq.f32.partialorder %v37_v2, 2.0 }
  0x1b   :  { %vm60_vm1 = vcmp.eq.f32.partialorder %v44_v1, 1.0  ;;  %vm92_vm3 = vcmp.eq.f32.partialorder %v44_v1, 0.0  ;;  %vm76_vm4 = vmor %vm52_vm0, %vm68_vm2  ;;  %vm61_vm9 = vcmp.eq.f32.partialorder %v45_v3, 1.0  ;;  %v38_v4 = vld [vmem:[#allocation2 + $0x10] sm:$0xff]  ;;  %vm93_vm11 = vcmp.eq.f32.partialorder %v45_v3, 0.0  ;;  %v39_v8 = vld [vmem:[#allocation2 + $0x18] sm:$0xff] }
  0x1c   :  { %vm84_vm5 = vmand %vm60_vm1, %vm76_vm4  ;;  %v46_v5 = vld [vmem:[#allocation5 + $0x10] sm:$0xff]  ;;  %vm54_vm14 = vcmp.eq.f32.partialorder %v38_v4, 3.0  ;;  %vm70_vm15 = vcmp.eq.f32.partialorder %v38_v4, 2.0  ;;  %v47_v9 = vld [vmem:[#allocation5 + $0x18] sm:$0xff]  ;;  %s138_s1 = sshll.u32 %s221_s0, 4  ;;  %s139_s1 = int_to_ptr.vmem [resolvable:$true] %s138_s1 }
  0x1d   :  { %vm100_vm8 = vmand %vm92_vm3, %vm52_vm0  ;;  %vm62_vm1 = vcmp.eq.f32.partialorder %v46_v5, 1.0  ;;  %vm94_vm0 = vcmp.eq.f32.partialorder %v46_v5, 0.0  ;;  %v40_v11 = vld [vmem:[#allocation2 + $0x20] sm:$0xff]  ;;  %v41_v14 = vld [vmem:[#allocation2 + $0x28] sm:$0xff]  ;;  %s192_s19 = scalar_lea.vmem %s139_s1, 1024  ;;  %p197_p11 = scmp.lt.s32.totalorder %s139_s1, %s139_s1 }
  0x1e   :  { %vm108_vm10 = vmor %vm84_vm5, %vm100_vm8  ;;  %vm55_vm8 = vcmp.eq.f32.partialorder %v39_v8, 3.0  ;;  %v48_v12 = vld [vmem:[#allocation5 + $0x20] sm:$0xff]  ;;  %v49_v15 = vld [vmem:[#allocation5 + $0x28] sm:$0xff]  ;;  %p193_p10 = scmp.ne.s32.totalorder %s139_s1, %s192_s19  ;;  %p198_p12 = scmp.lt.s32.totalorder %s192_s19, %s192_s19 }
  0x1f   :  { %v116_v7 = vsel %vm108_vm10, 1.0, %v220_v6  ;;  %vm77_vm12 = vmor %vm53_vm6, %vm69_vm7  ;;  %vm71_vm10 = vcmp.eq.f32.partialorder %v39_v8, 2.0  ;;  %v42_v17 = vld [vmem:[#allocation2 + $0x30] sm:$0xff]  ;;  %v43_v20 = vld [vmem:[#allocation2 + $0x38] sm:$0xff] }
  0x20   :  { %124 = vst [vmem:[#allocation7] sm:$0xff] %v116_v7  ;;  %vm85_vm13 = vmand %vm61_vm9, %vm77_vm12  ;;  %vm63_vm9 = vcmp.eq.f32.partialorder %v47_v9, 1.0  ;;  %v50_v18 = vld [vmem:[#allocation5 + $0x30] sm:$0xff]  ;;  %v51_v21 = vld [vmem:[#allocation5 + $0x38] sm:$0xff]  ;;  %p199_p13 = por %p198_p12, %p197_p11 }
  0x21   :  { %vm101_vm2 = vmand %vm93_vm11, %vm53_vm6  ;;  %vm95_vm6 = vcmp.eq.f32.partialorder %v47_v9, 0.0 }
  0x22   :  { %vm109_vm4 = vmor %vm85_vm13, %vm101_vm2  ;;  %vm56_vm2 = vcmp.eq.f32.partialorder %v40_v11, 3.0  ;;  %p200_p0 = pnand %p199_p13, %p193_p10 }
  0x23   :  { %v117_v10 = vsel %vm109_vm4, 1.0, %v220_v6  ;;  %vm78_vm3 = vmor %vm54_vm14, %vm70_vm15  ;;  %vm72_vm4 = vcmp.eq.f32.partialorder %v40_v11, 2.0 }
  0x24   :  { %125 = vst [vmem:[#allocation7 + $0x8] sm:$0xff] %v117_v10  ;;  %vm86_vm5 = vmand %vm62_vm1, %vm78_vm3  ;;  %vm64_vm1 = vcmp.eq.f32.partialorder %v48_v12, 1.0 }
  0x25   :  { %vm102_vm7 = vmand %vm94_vm0, %vm54_vm14  ;;  %vm96_vm0 = vcmp.eq.f32.partialorder %v48_v12, 0.0 }
  0x26   :  { %vm110_vm12 = vmor %vm86_vm5, %vm102_vm7  ;;  %vm57_vm7 = vcmp.eq.f32.partialorder %v41_v14, 3.0 }
  0x27   :  { %v118_v13 = vsel %vm110_vm12, 1.0, %v220_v6  ;;  %vm79_vm11 = vmor %vm55_vm8, %vm71_vm10  ;;  %vm73_vm12 = vcmp.eq.f32.partialorder %v41_v14, 2.0 }
  0x28   :  { %126 = vst [vmem:[#allocation7 + $0x10] sm:$0xff] %v118_v13  ;;  %vm87_vm13 = vmand %vm63_vm9, %vm79_vm11  ;;  %vm65_vm9 = vcmp.eq.f32.partialorder %v49_v15, 1.0 }
  0x29   :  { %vm103_vm15 = vmand %vm95_vm6, %vm55_vm8  ;;  %vm97_vm6 = vcmp.eq.f32.partialorder %v49_v15, 0.0 }
  0x2a   :  { %vm111_vm3 = vmor %vm87_vm13, %vm103_vm15  ;;  %vm58_vm15 = vcmp.eq.f32.partialorder %v42_v17, 3.0 }
  0x2b   :  { %v119_v16 = vsel %vm111_vm3, 1.0, %v220_v6  ;;  %vm80_vm14 = vmor %vm56_vm2, %vm72_vm4  ;;  %vm74_vm3 = vcmp.eq.f32.partialorder %v42_v17, 2.0 }
  0x2c   :  { %127 = vst [vmem:[#allocation7 + $0x18] sm:$0xff] %v119_v16  ;;  %vm88_vm5 = vmand %vm64_vm1, %vm80_vm14  ;;  %vm66_vm1 = vcmp.eq.f32.partialorder %v50_v18, 1.0 }
  0x2d   :  { %vm104_vm10 = vmand %vm96_vm0, %vm56_vm2  ;;  %vm98_vm0 = vcmp.eq.f32.partialorder %v50_v18, 0.0 }
  0x2e   :  { %vm112_vm11 = vmor %vm88_vm5, %vm104_vm10  ;;  %vm59_vm10 = vcmp.eq.f32.partialorder %v43_v20, 3.0 }
  0x2f   :  { %v120_v19 = vsel %vm112_vm11, 1.0, %v220_v6  ;;  %vm81_vm8 = vmor %vm57_vm7, %vm73_vm12  ;;  %vm75_vm11 = vcmp.eq.f32.partialorder %v43_v20, 2.0 }
  0x30   :  { %128 = vst [vmem:[#allocation7 + $0x20] sm:$0xff] %v120_v19  ;;  %vm89_vm13 = vmand %vm65_vm9, %vm81_vm8  ;;  %vm67_vm8 = vcmp.eq.f32.partialorder %v51_v21, 1.0 }
  0x31   :  { %vm105_vm4 = vmand %vm97_vm6, %vm57_vm7  ;;  %vm99_vm6 = vcmp.eq.f32.partialorder %v51_v21, 0.0 }
  0x32   :  { %vm113_vm14 = vmor %vm89_vm13, %vm105_vm4 }
  0x33   :  { %v121_v22 = vsel %vm113_vm14, 1.0, %v220_v6  ;;  %vm82_vm2 = vmor %vm58_vm15, %vm74_vm3 }
  0x34   :  { %129 = vst [vmem:[#allocation7 + $0x28] sm:$0xff] %v121_v22  ;;  %vm90_vm5 = vmand %vm66_vm1, %vm82_vm2 }
  0x35   :  { %vm106_vm12 = vmand %vm98_vm0, %vm58_vm15 }
  0x36   :  { %vm114_vm9 = vmor %vm90_vm5, %vm106_vm12 }
  0x37   :  { %v122_v23 = vsel %vm114_vm9, 1.0, %v220_v6  ;;  %vm83_vm7 = vmor %vm59_vm10, %vm75_vm11 }
  0x38   :  { %130 = vst [vmem:[#allocation7 + $0x30] sm:$0xff] %v122_v23  ;;  %vm91_vm13 = vmand %vm67_vm8, %vm83_vm7 }
  0x39   :  { %vm107_vm4 = vmand %vm99_vm6, %vm59_vm10 }
  0x3a   :  { %vm115_vm14 = vmor %vm91_vm13, %vm107_vm4 }
  0x3b   :  { %v123_v24 = vsel %vm115_vm14, 1.0, %v220_v6 }
  0x3c   :  { %131 = vst [vmem:[#allocation7 + $0x38] sm:$0xff] %v123_v24 }
  0x3d   :  { %203 = shalt.err (!%p200_p0)
}
  0x3e   :  { %141 = dma.vmem_to_hbm [thread:$0]  %s139_s1, 1024, %s258_s2, [#allocation4]  }
  0x3f   :  { %216 = dma.done.wait [#allocation4], 1024  }
  0x40   :  { %217 = vsyncadd [#allocation4], 4294966272 }
  0x41   :  { %145 = vsyncpa [#allocation3], 1 }
  0x42   :  { %146 = vsyncpa [#allocation6], 1 }
  0x43   :  { %147 = vsyncpa [#allocation4], 1 }

</bundles_post_ra>
